<compile_context>
chip_gen: v5e
topology: v5e:2x2
jax: 0.10.0
libtpu: 0.0.40
codegen_flags: <defaults>
</compile_context>

<pallas_src>
import functools

import jax
import jax.numpy as jnp
from jax.experimental import pallas as pl
from jax.experimental.pallas import tpu as pltpu

IN_F = 10    # decoder input features
HID = 100    # hidden / output features
NP = 128     # lane-padded feature width (multiple of 128)


def decoder_kernel(x_ref, w1_ref, b1_ref, w2_ref, b2_ref, w3_ref, b3_ref, o_ref):
    x = x_ref[...]

    # Layer 1: Linear(10 -> 128-padded) + ReLU   (padded lanes stay exactly 0)
    h1 = jnp.dot(x, w1_ref[...], preferred_element_type=jnp.float32) + b1_ref[...]
    h1 = jnp.maximum(h1, 0.0)

    # Layer 2: Linear(128-padded) + ReLU
    h2 = jnp.dot(h1, w2_ref[...], preferred_element_type=jnp.float32) + b2_ref[...]
    h2 = jnp.maximum(h2, 0.0)

    # Layer 3: Linear(128-padded); only the first HID lanes are real.
    h3 = jnp.dot(h2, w3_ref[...], preferred_element_type=jnp.float32) + b3_ref[...]

    # Sigmoid on the valid 100 lanes, masked 100-lane store (out ref is (tm, 100)).
    o_ref[...] = jax.nn.sigmoid(h3[:, :HID]).astype(o_ref.dtype)


def pad_params(params):
    """Zero-pad feature dims (100 -> 128) once, outside the jitted forward."""
    w1 = jnp.zeros((IN_F, NP), jnp.float32).at[:, :HID].set(params["w1"])
    w2 = jnp.zeros((NP, NP), jnp.float32).at[:HID, :HID].set(params["w2"])
    w3 = jnp.zeros((NP, NP), jnp.float32).at[:HID, :HID].set(params["w3"])
    b1 = jnp.zeros((1, NP), jnp.float32).at[:, :HID].set(params["b1"])
    b2 = jnp.zeros((1, NP), jnp.float32).at[:, :HID].set(params["b2"])
    b3 = jnp.zeros((1, NP), jnp.float32).at[:, :HID].set(params["b3"])
    return w1, b1, w2, b2, w3, b3


def _ceil_to(v, m):
    return ((v + m - 1) // m) * m


@functools.partial(jax.jit, static_argnames=("tm",))
def decoder_forward(x, w1, b1, w2, b2, w3, b3, *, tm=2048):
    """x: (B, 10) float32. Weights pre-transposed to (in, out), biases (1, out), padded."""
    B = x.shape[0]

    # Batch tile: sublane-aligned, capped at ~half the batch so the grid has >= 2 tiles
    # whenever B is large enough (lets "parallel" shard across v7x's two TensorCores).
    if B <= 16:
        tm_eff = B            # block rows == full array dim -> satisfies the (8,128) rule
    else:
        half = -(-B // 2)
        align = 256 if B >= 512 else 8   # keep MXU M-cadence clean for big batches
        tm_eff = max(8, min(tm, _ceil_to(half, align)))
    grid_b = pl.cdiv(B, tm_eff)

    const_map = lambda i: (0, 0)  # weights/biases: same block every step (VMEM-resident)
    # NOTE: weights are ~134 KiB total, so the default double-buffered copy is negligible;
    # pipeline_mode=pl.Buffered(1) would shave it but buys nothing measurable here.

    rows_comp = grid_b * tm_eff  # compute actually executed (includes ragged-tile padding)
    cost = pl.CostEstimate(
        flops=2 * rows_comp * (IN_F * NP + NP * NP + NP * NP),
        transcendentals=rows_comp * HID,                               # sigmoid
        bytes_accessed=B * 4 * IN_F                                    # x read
        + B * 4 * HID                                                  # out written
        + 4 * (IN_F * NP + 2 * NP * NP + 3 * NP),                      # weights + biases
    )

    return pl.pallas_call(
        decoder_kernel,
        out_shape=jax.ShapeDtypeStruct((B, HID), jnp.float32),
        grid=(grid_b,),
        in_specs=[
            pl.BlockSpec((tm_eff, IN_F), lambda i: (i, 0)),  # x: streamed batch tiles
            pl.BlockSpec((IN_F, NP), const_map),             # w1
            pl.BlockSpec((1, NP), const_map),                # b1
            pl.BlockSpec((NP, NP), const_map),                # w2
            pl.BlockSpec((1, NP), const_map),                # b2
            pl.BlockSpec((NP, NP), const_map),                # w3
            pl.BlockSpec((1, NP), const_map),                # b3
        ],
        out_specs=pl.BlockSpec((tm_eff, HID), lambda i: (i, 0)),  # direct (B,100) output
        compiler_params=pltpu.CompilerParams(
            dimension_semantics=("parallel",),               # megacore sharding on v7x
        ),
        cost_estimate=cost,
    )(x, w1, b1, w2, b2, w3, b3)


def init_params(key):
    """Deterministic init mimicking PyTorch's default Linear init U(-1/sqrt(fan_in), +)."""
    def linear(key, fan_in, fan_out):
        kw, kb = jax.random.split(key)
        bound = 1.0 / jnp.sqrt(fan_in)
        # stored as (in, out) = W.T relative to PyTorch's (out, in)
        w = jax.random.uniform(kw, (fan_in, fan_out), jnp.float32, -bound, bound)
        b = jax.random.uniform(kb, (1, fan_out), jnp.float32, -bound, bound)
        return w, b

    k1, k2, k3 = jax.random.split(key, 3)
    w1, b1 = linear(k1, IN_F, HID)
    w2, b2 = linear(k2, HID, HID)
    w3, b3 = linear(k3, HID, HID)
    return {"w1": w1, "b1": b1, "w2": w2, "b2": b2, "w3": w3, "b3": b3}


def reference_forward(x, params):
    dot = lambda a, b: jnp.dot(a, b, precision=jax.lax.Precision.HIGHEST)
    h = jnp.maximum(dot(x, params["w1"]) + params["b1"], 0.0)
    h = jnp.maximum(dot(h, params["w2"]) + params["b2"], 0.0)
    return jax.nn.sigmoid(dot(h, params["w3"]) + params["b3"])


if __name__ == "__main__":
    key = jax.random.PRNGKey(0)
    kp, kx1, kx2 = jax.random.split(key, 3)
    params = init_params(kp)
    padded = pad_params(params)

    # Small batch: single-tile path (tm_eff == B).
    B1 = 8
    x1 = jax.random.normal(kx1, (B1, IN_F), jnp.float32)
    out1 = decoder_forward(x1, *padded)
    jax.block_until_ready(out1)
    ref1 = reference_forward(x1, params)
    assert out1.shape == (B1, HID)
    assert jnp.allclose(out1, ref1, atol=1e-5, rtol=1e-5), "mismatch (small batch)"

    # Multi-tile path with a ragged (masked) final tile: B=37, tile=16 -> grid=3.
    B2 = 37
    x2 = jax.random.normal(kx2, (B2, IN_F), jnp.float32)
    out2 = decoder_forward(x2, *padded, tm=16)
    jax.block_until_ready(out2)
    ref2 = reference_forward(x2, params)
    assert out2.shape == (B2, HID)
    assert jnp.allclose(out2, ref2, atol=1e-5, rtol=1e-5), "mismatch (tiled batch)"

    print("KERNEL_OK")
</pallas_src>

<mosaic_0001>
module attributes {stable_mosaic.version = 11 : i64} {
  func.func @decoder_kernel(%arg0: i32, %arg1: memref<8x10xf32, #tpu.memory_space<vmem>>, %arg2: memref<10x128xf32, #tpu.memory_space<vmem>>, %arg3: memref<1x128xf32, #tpu.memory_space<vmem>>, %arg4: memref<128x128xf32, #tpu.memory_space<vmem>>, %arg5: memref<1x128xf32, #tpu.memory_space<vmem>>, %arg6: memref<128x128xf32, #tpu.memory_space<vmem>>, %arg7: memref<1x128xf32, #tpu.memory_space<vmem>>, %arg8: memref<8x100xf32, #tpu.memory_space<vmem>>) attributes {dimension_semantics = [#tpu.dimension_semantics<parallel>], iteration_bounds = array<i64: 1>, scalar_prefetch = 0 : i64, scratch_operands = 0 : i64, tpu.core_type = #tpu.core_type<tc>, window_params = [{transform_indices = @transform_0, window_bounds = array<i64: 8, 10>}, {pipeline_mode = #tpu.pipeline_mode<synchronous>, transform_indices = @transform_1, window_bounds = array<i64: 10, 128>}, {pipeline_mode = #tpu.pipeline_mode<synchronous>, transform_indices = @transform_2, window_bounds = array<i64: 1, 128>}, {pipeline_mode = #tpu.pipeline_mode<synchronous>, transform_indices = @transform_3, window_bounds = array<i64: 128, 128>}, {pipeline_mode = #tpu.pipeline_mode<synchronous>, transform_indices = @transform_4, window_bounds = array<i64: 1, 128>}, {pipeline_mode = #tpu.pipeline_mode<synchronous>, transform_indices = @transform_5, window_bounds = array<i64: 128, 128>}, {pipeline_mode = #tpu.pipeline_mode<synchronous>, transform_indices = @transform_6, window_bounds = array<i64: 1, 128>}, {transform_indices = @transform_7, window_bounds = array<i64: 8, 100>}]} {
    %c0 = arith.constant 0 : index
    %c0_0 = arith.constant 0 : index
    %0 = vector.load %arg1[%c0, %c0_0] : memref<8x10xf32, #tpu.memory_space<vmem>>, vector<8x10xf32>
    %c0_1 = arith.constant 0 : index
    %c0_2 = arith.constant 0 : index
    %1 = vector.load %arg2[%c0_1, %c0_2] : memref<10x128xf32, #tpu.memory_space<vmem>>, vector<10x128xf32>
    %cst = arith.constant dense<0.000000e+00> : vector<8x128xf32>
    %2 = tpu.matmul %0, %1, %cst {dimension_numbers = #tpu.dot_dimension_numbers<[1], [0], [0], [1], [0, 0, 1, 1], [], []>} : vector<8x10xf32>, vector<10x128xf32>, vector<8x128xf32> -> vector<8x128xf32>
    %c0_3 = arith.constant 0 : index
    %c0_4 = arith.constant 0 : index
    %3 = vector.load %arg3[%c0_3, %c0_4] : memref<1x128xf32, #tpu.memory_space<vmem>>, vector<1x128xf32>
    %4 = vector.broadcast %3 : vector<1x128xf32> to vector<8x128xf32>
    %5 = arith.addf %2, %4 : vector<8x128xf32>
    %cst_5 = arith.constant 0.000000e+00 : f32
    %6 = vector.broadcast %cst_5 : f32 to vector<8x128xf32>
    %7 = arith.maximumf %5, %6 : vector<8x128xf32>
    %c0_6 = arith.constant 0 : index
    %c0_7 = arith.constant 0 : index
    %8 = vector.load %arg4[%c0_6, %c0_7] : memref<128x128xf32, #tpu.memory_space<vmem>>, vector<128x128xf32>
    %cst_8 = arith.constant dense<0.000000e+00> : vector<8x128xf32>
    %9 = tpu.matmul %7, %8, %cst_8 {dimension_numbers = #tpu.dot_dimension_numbers<[1], [0], [0], [1], [0, 0, 1, 1], [], []>} : vector<8x128xf32>, vector<128x128xf32>, vector<8x128xf32> -> vector<8x128xf32>
    %c0_9 = arith.constant 0 : index
    %c0_10 = arith.constant 0 : index
    %10 = vector.load %arg5[%c0_9, %c0_10] : memref<1x128xf32, #tpu.memory_space<vmem>>, vector<1x128xf32>
    %11 = vector.broadcast %10 : vector<1x128xf32> to vector<8x128xf32>
    %12 = arith.addf %9, %11 : vector<8x128xf32>
    %cst_11 = arith.constant 0.000000e+00 : f32
    %13 = vector.broadcast %cst_11 : f32 to vector<8x128xf32>
    %14 = arith.maximumf %12, %13 : vector<8x128xf32>
    %c0_12 = arith.constant 0 : index
    %c0_13 = arith.constant 0 : index
    %15 = vector.load %arg6[%c0_12, %c0_13] : memref<128x128xf32, #tpu.memory_space<vmem>>, vector<128x128xf32>
    %cst_14 = arith.constant dense<0.000000e+00> : vector<8x128xf32>
    %16 = tpu.matmul %14, %15, %cst_14 {dimension_numbers = #tpu.dot_dimension_numbers<[1], [0], [0], [1], [0, 0, 1, 1], [], []>} : vector<8x128xf32>, vector<128x128xf32>, vector<8x128xf32> -> vector<8x128xf32>
    %c0_15 = arith.constant 0 : index
    %c0_16 = arith.constant 0 : index
    %17 = vector.load %arg7[%c0_15, %c0_16] : memref<1x128xf32, #tpu.memory_space<vmem>>, vector<1x128xf32>
    %18 = vector.broadcast %17 : vector<1x128xf32> to vector<8x128xf32>
    %19 = arith.addf %16, %18 : vector<8x128xf32>
    %20 = vector.extract_strided_slice %19 {offsets = [0, 0], sizes = [8, 100], strides = [1, 1]} : vector<8x128xf32> to vector<8x100xf32>
    %21 = arith.negf %20 : vector<8x100xf32>
    %22 = math.exp %21 : vector<8x100xf32>
    %cst_17 = arith.constant 1.000000e+00 : f32
    %23 = vector.broadcast %cst_17 : f32 to vector<8x100xf32>
    %24 = arith.addf %23, %22 : vector<8x100xf32>
    %25 = arith.divf %23, %24 : vector<8x100xf32>
    %c0_18 = arith.constant 0 : index
    %c0_19 = arith.constant 0 : index
    %26 = vector.load %arg8[%c0_18, %c0_19] : memref<8x100xf32, #tpu.memory_space<vmem>>, vector<8x100xf32>
    tpu.vector_store %arg8[%c0_18, %c0_19], %25 {strides = array<i32>} : memref<8x100xf32, #tpu.memory_space<vmem>>, vector<8x100xf32>,
    return
  }
  func.func @transform_0(%arg0: i32) -> (i32, i32) {
    %c0_i32 = arith.constant 0 : i32
    %c0_i32_0 = arith.constant 0 : i32
    return %arg0, %c0_i32 : i32, i32
  }
  func.func @transform_1(%arg0: i32) -> (i32, i32) {
    %c0_i32 = arith.constant 0 : i32
    %c0_i32_0 = arith.constant 0 : i32
    %c0_i32_1 = arith.constant 0 : i32
    return %c0_i32, %c0_i32_0 : i32, i32
  }
  func.func @transform_2(%arg0: i32) -> (i32, i32) {
    %c0_i32 = arith.constant 0 : i32
    %c0_i32_0 = arith.constant 0 : i32
    %c0_i32_1 = arith.constant 0 : i32
    return %c0_i32, %c0_i32_0 : i32, i32
  }
  func.func @transform_3(%arg0: i32) -> (i32, i32) {
    %c0_i32 = arith.constant 0 : i32
    %c0_i32_0 = arith.constant 0 : i32
    %c0_i32_1 = arith.constant 0 : i32
    return %c0_i32, %c0_i32_0 : i32, i32
  }
  func.func @transform_4(%arg0: i32) -> (i32, i32) {
    %c0_i32 = arith.constant 0 : i32
    %c0_i32_0 = arith.constant 0 : i32
    %c0_i32_1 = arith.constant 0 : i32
    return %c0_i32, %c0_i32_0 : i32, i32
  }
  func.func @transform_5(%arg0: i32) -> (i32, i32) {
    %c0_i32 = arith.constant 0 : i32
    %c0_i32_0 = arith.constant 0 : i32
    %c0_i32_1 = arith.constant 0 : i32
    return %c0_i32, %c0_i32_0 : i32, i32
  }
  func.func @transform_6(%arg0: i32) -> (i32, i32) {
    %c0_i32 = arith.constant 0 : i32
    %c0_i32_0 = arith.constant 0 : i32
    %c0_i32_1 = arith.constant 0 : i32
    return %c0_i32, %c0_i32_0 : i32, i32
  }
  func.func @transform_7(%arg0: i32) -> (i32, i32) {
    %c0_i32 = arith.constant 0 : i32
    %c0_i32_0 = arith.constant 0 : i32
    return %arg0, %c0_i32 : i32, i32
  }
}

</mosaic_0001>

<bundles_post_ra>
// kernel: decoder_forward.1
= control target key start
LH: loop header
LB: loop body
LE: loop exit
PB: predicated region body
PF: predicated region fallthrough
CT: control target
= control target key end

     0   :  { %12 = vsyncpa [#allocation3], 0  ;;  %s461_s0 = inlined_call_operand.hbm [shape: f32[8,10], index: 0, kind: input, shape index: {}]   ;;  %s462_s1 = inlined_call_operand.hbm [shape: f32[10,128], index: 1, kind: input, shape index: {}]   ;;  %s463_s2 = inlined_call_operand.vmem [shape: f32[1,128], index: 2, kind: input, shape index: {}]   ;;  %s464_s3 = inlined_call_operand.hbm [shape: f32[128,128], index: 3, kind: input, shape index: {}]   ;;  %s465_s4 = inlined_call_operand.vmem [shape: f32[1,128], index: 4, kind: input, shape index: {}]   ;;  %s466_s5 = inlined_call_operand.hbm [shape: f32[128,128], index: 5, kind: input, shape index: {}]   ;;  %s467_s6 = inlined_call_operand.vmem [shape: f32[1,128], index: 6, kind: input, shape index: {}]   ;;  %s468_s7 = inlined_call_operand.hbm [shape: f32[8,100], index: 7, kind: output, shape index: {}]  }
   0x1   :  { %13 = vsyncpa [#allocation6], 0 }
   0x2   :  { %14 = vsyncpa [#allocation9], 0  ;;  %s31_s26 = sshll.u32 %s462_s1, 4  ;;  %s32_s26 = int_to_ptr.hbm [resolvable:$true] %s31_s26 }
   0x3   :  { %15 = vsyncpa [#allocation4], 0  ;;  %s390_s27 = smov [#allocation5]   ;;  %s21_s8 = sshll.u32 %s461_s0, 4  ;;  %s22_s8 = int_to_ptr.hbm [resolvable:$true] %s21_s8 }
   0x4   :  { %s33_s28 = sshll.u32 %s390_s27, 4  ;;  %s391_s9 = smov 128   ;;  %s34_s28 = int_to_ptr.vmem [resolvable:$true] %s33_s28 }
   0x5   :  { %s392_s10 = smov 8   ;;  %s393_s11 = smov [#allocation2]  }
   0x6   :  { %39 = dma.hbm_to_vmem [thread:$0]  %s32_s26, 256, %s34_s28, [#allocation6], %s391_s9, %s391_s9, %s392_s10  }
   0x7   :  { %s23_s12 = sshll.u32 %s393_s11, 4  ;;  %s46_s15 = sshll.u32 %s464_s3, 4  ;;  %s24_s12 = int_to_ptr.vmem [resolvable:$true] %s23_s12  ;;  %s47_s15 = int_to_ptr.hbm [resolvable:$true] %s46_s15 }
   0x8   :  { %26 = dma.hbm_to_vmem [thread:$0]  %s22_s8, 128, %s24_s12, [#allocation3]  }
   0x9   :  { %s61_s17 = sshll.u32 %s466_s5, 4  ;;  %s394_s18 = smov [#allocation7]   ;;  %s62_s17 = int_to_ptr.hbm [resolvable:$true] %s61_s17 }
   0xa   :  { %s48_s19 = sshll.u32 %s394_s18, 4  ;;  %s395_s0 = smov [#allocation8]   ;;  %s49_s19 = int_to_ptr.vmem [resolvable:$true] %s48_s19 }
   0xb   :  { %54 = dma.hbm_to_vmem [thread:$0]  %s47_s15, 2048, %s49_s19, [#allocation6], %s391_s9, %s391_s9, %s392_s10  }
   0xc   :  { %s63_s20 = sshll.u32 %s395_s0, 4  ;;  %s64_s20 = int_to_ptr.vmem [resolvable:$true] %s63_s20 }
   0xd   :  { %69 = dma.hbm_to_vmem [thread:$0]  %s62_s17, 2048, %s64_s20, [#allocation9], %s391_s9, %s391_s9, %s392_s10  }
   0xe   :  { %382 = dma.done.wait [#allocation3], 128  }
   0xf   :  { %383 = vsyncadd [#allocation3], 4294967168 }
  0x10   :  { %384 = dma.done.wait [#allocation6], 2304  }
  0x11   :  { %385 = vsyncadd [#allocation6], 4294964992 }
  0x12   :  { %386 = dma.done.wait [#allocation9], 2048  }
  0x13   :  { %387 = vsyncadd [#allocation9], 4294965248  ;;  %vm99_vm0 = vcmask 1041408   ;;  %v90_v0 = vld [vmem:[#allocation5 + $0x8] sm:$0x3]  ;;  %v89_v1 = vld [vmem:[#allocation5] sm:$0xff] }
  0x14   :  { %245 = vmatpush.msk.msra.mxu0 %vm99_vm0, %v90_v0  ;;  %v88_v2 = vld [vmem:[#allocation2] sm:$0xff]  ;;  %vm95_vm1 = vcmask 80896   ;;  %v139_v3 = vld [vmem:[#allocation7 + $0x78] sm:$0xff]  ;;  %v138_v4 = vld [vmem:[#allocation7 + $0x70] sm:$0xff]  ;;  %vm224_vm5 = vcmask 818176  }
  0x15   :  { %144 = vmatpush.msra.mxu1 %v139_v3  ;;  %v137_v5 = vld [vmem:[#allocation7 + $0x68] sm:$0xff]  ;;  %v136_v6 = vld [vmem:[#allocation7 + $0x60] sm:$0xff]  ;;  %v135_v7 = vld [vmem:[#allocation7 + $0x58] sm:$0xff] }
  0x16   :  { %118 = vmatpush.msra.mxu0 %v89_v1  ;;  %v134_v8 = vld [vmem:[#allocation7 + $0x50] sm:$0xff]  ;;  %v133_v9 = vld [vmem:[#allocation7 + $0x48] sm:$0xff]  ;;  %v132_v10 = vld [vmem:[#allocation7 + $0x40] sm:$0xff] }
  0x17   :  { %246 = vmatmul.msk.f32.vlgmr.msra.gmra.mxu0 %vm95_vm1, %v88_v2  ;;  %145 = vmatpush.msra.mxu1 %v138_v4  ;;  %v131_v11 = vld [vmem:[#allocation7 + $0x38] sm:$0xff]  ;;  %v130_v12 = vld [vmem:[#allocation7 + $0x30] sm:$0xff]  ;;  %v129_v13 = vld [vmem:[#allocation7 + $0x28] sm:$0xff] }
  0x18   :  { %v128_v14 = vld [vmem:[#allocation7 + $0x20] sm:$0xff]  ;;  %v127_v15 = vld [vmem:[#allocation7 + $0x18] sm:$0xff]  ;;  %v126_v16 = vld [vmem:[#allocation7 + $0x10] sm:$0xff] }
  0x19   :  { %146 = vmatpush.msra.mxu1 %v137_v5  ;;  %v125_v17 = vld [vmem:[#allocation7 + $0x8] sm:$0xff]  ;;  %v124_v18 = vld [vmem:[#allocation7] sm:$0xff]  ;;  %v180_v19 = vld [vmem:[#allocation8 + $0x78] sm:$0xff] }
  0x1a   :  { %v179_v20 = vld [vmem:[#allocation8 + $0x70] sm:$0xff]  ;;  %185 = vmatpush.msra.mxu2 %v180_v19  ;;  %v178_v21 = vld [vmem:[#allocation8 + $0x68] sm:$0xff]  ;;  %v177_v22 = vld [vmem:[#allocation8 + $0x60] sm:$0xff] }
  0x1b   :  { %147 = vmatpush.msra.mxu1 %v136_v6  ;;  %v176_v23 = vld [vmem:[#allocation8 + $0x58] sm:$0xff]  ;;  %v175_v24 = vld [vmem:[#allocation8 + $0x50] sm:$0xff]  ;;  %v174_v25 = vld [vmem:[#allocation8 + $0x48] sm:$0xff] }
  0x1c   :  { %186 = vmatpush.msra.mxu2 %v179_v20  ;;  %v173_v26 = vld [vmem:[#allocation8 + $0x40] sm:$0xff]  ;;  %v172_v27 = vld [vmem:[#allocation8 + $0x38] sm:$0xff]  ;;  %v171_v28 = vld [vmem:[#allocation8 + $0x30] sm:$0xff] }
  0x1d   :  { %148 = vmatpush.msra.mxu1 %v135_v7  ;;  %v170_v29 = vld [vmem:[#allocation8 + $0x28] sm:$0xff]  ;;  %v169_v30 = vld [vmem:[#allocation8 + $0x20] sm:$0xff]  ;;  %v168_v31 = vld [vmem:[#allocation8 + $0x18] sm:$0xff] }
  0x1e   :  { %187 = vmatpush.msra.mxu2 %v178_v21  ;;  %v255_v32 = vld [vmem:[%s463_s2] ss:$0 sm:$0xff]  ;;  %v167_v36 = vld [vmem:[#allocation8 + $0x10] sm:$0xff]  ;;  %v165_v38 = vld [vmem:[#allocation8] sm:$0xff] }
  0x1f   :  { %149 = vmatpush.msra.mxu1 %v134_v8  ;;  %v166_v37 = vld [vmem:[#allocation8 + $0x8] sm:$0xff] }
  0x20   :  { %188 = vmatpush.msra.mxu2 %v177_v22  ;;  %v256_v39 = vld [vmem:[%s465_s4] ss:$0 sm:$0xff]  ;;  %s396_s4 = smov [#allocation10]  }
  0x21   :  { %150 = vmatpush.msra.mxu1 %v133_v9  ;;  %v257_v43 = vld [vmem:[%s467_s6] ss:$0 sm:$0xff]  ;;  %s231_s24 = sshll.u32 %s396_s4, 4  ;;  %s233_s6 = sshll.u32 %s468_s7, 4  ;;  %s232_s24 = int_to_ptr.vmem [resolvable:$true] %s231_s24  ;;  %s234_s6 = int_to_ptr.hbm [resolvable:$true] %s233_s6 }
  0x22   :  { %189 = vmatpush.msra.mxu2 %v176_v23 }
  0x23   :  { %151 = vmatpush.msra.mxu1 %v132_v10 }
  0x24   :  { %190 = vmatpush.msra.mxu2 %v175_v24 }
  0x25   :  { %152 = vmatpush.msra.mxu1 %v131_v11 }
  0x26   :  { %191 = vmatpush.msra.mxu2 %v174_v25 }
  0x27   :  { %153 = vmatpush.msra.mxu1 %v130_v12 }
  0x28   :  { %192 = vmatpush.msra.mxu2 %v173_v26 }
  0x29   :  { %154 = vmatpush.msra.mxu1 %v129_v13 }
  0x2a   :  { %193 = vmatpush.msra.mxu2 %v172_v27 }
  0x2b   :  { %155 = vmatpush.msra.mxu1 %v128_v14 }
  0x2c   :  { %194 = vmatpush.msra.mxu2 %v171_v28 }
  0x2d   :  { %156 = vmatpush.msra.mxu1 %v127_v15 }
  0x2e   :  { %195 = vmatpush.msra.mxu2 %v170_v29 }
  0x2f   :  { %157 = vmatpush.msra.mxu1 %v126_v16 }
  0x30   :  { %196 = vmatpush.msra.mxu2 %v169_v30 }
  0x31   :  { %158 = vmatpush.msra.mxu1 %v125_v17 }
  0x32   :  { %197 = vmatpush.msra.mxu2 %v168_v31 }
  0x33   :  { %159 = vmatpush.msra.mxu1 %v124_v18 }
  0x34   :  { %198 = vmatpush.msra.mxu2 %v167_v36 }
  0x36   :  { %199 = vmatpush.msra.mxu2 %v166_v37 }
  0x38   :  { %200 = vmatpush.msra.mxu2 %v165_v38 }
  0x94   :  { %v120_v33 = vpop.f32.mrf.mxu0 }
  0x95   :  { %v121_v34 = vadd.f32 %v255_v32, %v120_v33 }
  0x97   :  { %v123_v35 = vmax.f32 %v121_v34, 0.0 }
  0x99   :  { %160 = vmatmul.f32.vlgmr.msra.gmra.mxu1 %v123_v35 }
 0x116   :  { %v161_v40 = vpop.f32.mrf.mxu1 }
 0x117   :  { %v162_v41 = vadd.f32 %v256_v39, %v161_v40 }
 0x119   :  { %v164_v42 = vmax.f32 %v162_v41, 0.0 }
 0x11b   :  { %201 = vmatmul.f32.vlgmr.msra.gmra.mxu2 %v164_v42 }
 0x19e   :  { %v202_v44 = vpop.f32.mrf.mxu2 }
 0x19f   :  { %v203_v45 = vadd.f32 %v257_v43, %v202_v44 }
 0x1a1   :  { %v247_v46 = vmul.f32 -1.442695, %v203_v45 }
 0x1a3   :  { %258 = vpow2.f32 %v247_v46 }
 0x1a9   :  { %v259_v47 = vpop.eup %258 }
 0x1aa   :  { %v208_v48 = vadd.f32 1.0, %v259_v47 }
 0x1ac   :  { %260 = vrcp.f32 %v208_v48  ;;  %v220_v52 = vand.u32 2147483648, %v208_v48  ;;  %v218_v54 = vand.u32 2147483647, %v208_v48  ;;  %vm214_vm3 = vweird.f32 %v208_v48 }
 0x1ae   :  { %v221_v56 = vor.u32 1.1754944e-38, %v220_v52  ;;  %vm219_vm6 = vcmp.eq.f32.partialorder %v218_v54, 8.507059e+37 }
 0x1b2   :  { %v261_v49 = vpop.eup %260 }
 0x1b3   :  { %v210_v50 = vmul.f32 %v261_v49, %v208_v48  ;;  %vm215_vm2 = vweird.f32 %v261_v49 }
 0x1b4   :  { %vm216_vm4 = vmor %vm214_vm3, %vm215_vm2 }
 0x1b5   :  { %v211_v51 = vsub.f32 1.0, %v210_v50 }
 0x1b7   :  { %v212_v53 = vmul.f32 %v261_v49, %v211_v51 }
 0x1b9   :  { %v213_v55 = vadd.f32 %v261_v49, %v212_v53 }
 0x1bb   :  { %v217_v57 = vsel %vm216_vm4, %v261_v49, %v213_v55 }
 0x1bc   :  { %v222_v58 = vsel %vm219_vm6, %v221_v56, %v217_v57 }
 0x1bd   :  { %225 = vst.msk [vmem:[#allocation10] sm:$0xff] %vm224_vm5, %v222_v58 }
 0x1be   :  { %236 = dma.vmem_to_hbm [thread:$0]  %s232_s24, 128, %s234_s6, [#allocation4]  }
 0x1bf   :  { %388 = dma.done.wait [#allocation4], 128  }
 0x1c0   :  { %389 = vsyncadd [#allocation4], 4294967168 }
 0x1c1   :  { %241 = vsyncpa [#allocation3], 1 }
 0x1c2   :  { %242 = vsyncpa [#allocation6], 1 }
 0x1c3   :  { %243 = vsyncpa [#allocation9], 1 }
 0x1c4   :  { %244 = vsyncpa [#allocation4], 1 }

</bundles_post_ra>
